<compile_context>
chip_gen: v7x
topology: tpu7x:2x2x1
jax: 0.10.0
libtpu: 0.0.40
codegen_flags: <defaults>
</compile_context>

<pallas_src>
import jax
import jax.numpy as jnp
from jax.experimental import pallas as pl
from jax.experimental.pallas import tpu as pltpu


def _round_up(v, m):
    return ((v + m - 1) // m) * m


# --------------------------------------------------------------------------
# Kernel 1: GRU weight evolution (one shot, tiny)
# --------------------------------------------------------------------------
def _evolve_weight_kernel(w0_ref, wihT_ref, whhT_ref, bih_ref, bhh_ref, wev_ref):
    """PyTorch GRU cell with x = h = W0, gate order (r, z, n).

    Gate matrices are pre-concatenated as (F, 3F) so all gate products are two
    MXU dots; W_ev is written zero-padded to Fp lanes with one unmasked store.
    """
    F = w0_ref.shape[0]
    Fp = wev_ref.shape[1]
    w0 = w0_ref[...]

    gi = jnp.dot(w0, wihT_ref[...], preferred_element_type=jnp.float32) + bih_ref[...]
    gh = jnp.dot(w0, whhT_ref[...], preferred_element_type=jnp.float32) + bhh_ref[...]

    r = jax.nn.sigmoid(gi[:, 0:F] + gh[:, 0:F])
    z = jax.nn.sigmoid(gi[:, F:2 * F] + gh[:, F:2 * F])
    n = jnp.tanh(gi[:, 2 * F:3 * F] + r * gh[:, 2 * F:3 * F])
    w_ev = (1.0 - z) * n + z * w0                       # evolved GCN weight (F, F)

    if Fp > F:                                          # lane-dense, single store
        w_ev = jnp.concatenate(
            [w_ev, jnp.zeros((F, Fp - F), w_ev.dtype)], axis=1)
    wev_ref[...] = w_ev.astype(wev_ref.dtype)


# --------------------------------------------------------------------------
# Kernel 2: per (row-tile, K-tile)  acc += A @ (D^-1/2 X);
#           epilogue: relu((D^-1/2 acc) @ W_ev) @ W_lin^T + b_lin
# --------------------------------------------------------------------------
def _gcn_relu_linear_kernel(a_ref, xs_ref, dinv_ref, wev_ref, wlinT_ref, blin_ref,
                            out_ref, acc_ref):
    k = pl.program_id(1)

    @pl.when(k == 0)
    def _init():
        acc_ref[...] = jnp.zeros_like(acc_ref)

    # bf16 x bf16 -> f32 accumulation on the MXU (A tile streamed from HBM).
    acc_ref[...] += jnp.dot(a_ref[...], xs_ref[...],
                            preferred_element_type=jnp.float32)

    @pl.when(k == pl.num_programs(1) - 1)
    def _finalize():
        h = acc_ref[...] * dinv_ref[...]                # row D^-1/2 -> A_norm @ X
        h = jnp.dot(h.astype(jnp.bfloat16), wev_ref[...],
                    preferred_element_type=jnp.float32)  # @ W_ev  -> (TM, Fp)
        h = jnp.maximum(h, 0.0)                          # ReLU
        out = jnp.dot(h.astype(jnp.bfloat16), wlinT_ref[...],
                      preferred_element_type=jnp.float32) + blin_ref[...]
        out_ref[...] = out.astype(out_ref.dtype)         # lane-dense (TM, Fp) store


# --------------------------------------------------------------------------
# Wrapper
# --------------------------------------------------------------------------
def recurrent_gcn_egcno(x, edge_index, edge_weight, params):
    """x: (N, F) f32; edge_index: (2, E) int (src, dst); edge_weight: (E,) f32."""
    N, F = x.shape
    Fp = _round_up(F, 128)                              # lane-dense feature axis

    # ---- tile sizes: cdiv + padding (no "N % TM == 0" requirement) --------
    n_i = pl.cdiv(N, 512)                               # target <= 512 rows/tile
    TM = _round_up(pl.cdiv(N, n_i), 16)                 # bf16 sublane packing
    Nr = n_i * TM
    n_k = pl.cdiv(N, 4096)                              # target <= ~4k K cols/tile
    TK = _round_up(pl.cdiv(N, n_k), 128)                # lane-aligned K tiles
    Nc = n_k * TK

    # ---- glue: dense adjacency (+ self-loops) built once, directly in bf16 --
    src = edge_index[0].astype(jnp.int32)
    dst = edge_index[1].astype(jnp.int32)
    nodes = jnp.arange(N, dtype=jnp.int32)
    src_all = jnp.concatenate([src, nodes])
    dst_all = jnp.concatenate([dst, nodes])
    w_all = jnp.concatenate([edge_weight.astype(jnp.float32),
                             jnp.ones((N,), jnp.float32)])

    a = jnp.zeros((Nr, Nc), jnp.bfloat16).at[dst_all, src_all].add(
        w_all.astype(jnp.bfloat16))                     # raw A (+ I), one N^2 pass
    deg = jnp.zeros((N,), jnp.float32).at[dst_all].add(w_all)   # O(E), not O(N^2)
    dinv = jnp.where(deg > 0.0, jax.lax.rsqrt(deg), 0.0)

    dinv_r = jnp.zeros((Nr, 1), jnp.float32).at[:N, 0].set(dinv)
    xs = jnp.zeros((Nc, F), jnp.bfloat16).at[:N, :].set(
        (dinv[:, None] * x.astype(jnp.float32)).astype(jnp.bfloat16))

    # ---- kernel 1: evolve GCN weight (one shot) ----------------------------
    wihT = params["w_ih"].T                             # (F, 3F): [r | z | n]
    whhT = params["w_hh"].T                             # (F, 3F)
    bih = params["b_ih"].reshape(1, 3 * F)
    bhh = params["b_hh"].reshape(1, 3 * F)

    vmem = pl.BlockSpec(memory_space=pltpu.MemorySpace.VMEM)
    w_ev_p = pl.pallas_call(
        _evolve_weight_kernel,
        out_shape=jax.ShapeDtypeStruct((F, Fp), jnp.bfloat16),
        in_specs=[vmem] * 5,
        out_specs=vmem,
    )(params["w0"].astype(jnp.float32), wihT, whhT, bih, bhh)

    # ---- lane-dense (padded) linear params, pre-transposed, bf16 ----------
    wlinT_p = jnp.zeros((Fp, Fp), jnp.bfloat16).at[:F, :F].set(
        params["w_lin"].T.astype(jnp.bfloat16))
    blin_p = jnp.zeros((1, Fp), jnp.float32).at[0, :F].set(params["b_lin"])

    # ---- kernel 2: (row-tile, K-tile) grid; VMEM bounded independent of N --
    out_p = pl.pallas_call(
        _gcn_relu_linear_kernel,
        out_shape=jax.ShapeDtypeStruct((Nr, Fp), jnp.float32),
        grid=(n_i, n_k),
        in_specs=[
            pl.BlockSpec((TM, TK), lambda i, k: (i, k)),   # A tiles: streamed
            pl.BlockSpec((TK, F), lambda i, k: (k, 0)),    # D^-1/2 X K-tiles
            pl.BlockSpec((TM, 1), lambda i, k: (i, 0)),    # row D^-1/2
            pl.BlockSpec((F, Fp), lambda i, k: (0, 0)),    # W_ev (tiny, resident)
            pl.BlockSpec((Fp, Fp), lambda i, k: (0, 0)),   # W_lin^T (resident)
            pl.BlockSpec((1, Fp), lambda i, k: (0, 0)),    # b_lin (resident)
        ],
        out_specs=pl.BlockSpec((TM, Fp), lambda i, k: (i, 0)),
        scratch_shapes=[pltpu.VMEM((TM, F), jnp.float32)],
        compiler_params=pltpu.CompilerParams(
            dimension_semantics=("parallel", "arbitrary"),
            vmem_limit_bytes=48 * 1024 * 1024,
        ),
    )(a, xs, dinv_r, w_ev_p, wlinT_p, blin_p)

    return out_p[:N, :F]


# --------------------------------------------------------------------------
# Pure-JAX reference (f32) and param init
# --------------------------------------------------------------------------
def _reference_forward(x, edge_index, edge_weight, params):
    N, F = x.shape
    src, dst = edge_index[0], edge_index[1]
    A = jnp.zeros((N, N), jnp.float32).at[dst, src].add(edge_weight.astype(jnp.float32))
    A = A + jnp.eye(N, dtype=jnp.float32)
    deg = A.sum(axis=1)
    dinv = jnp.where(deg > 0.0, jax.lax.rsqrt(deg), 0.0)
    a_norm = dinv[:, None] * A * dinv[None, :]

    w0 = params["w0"]
    gi = w0 @ params["w_ih"].T + params["b_ih"]
    gh = w0 @ params["w_hh"].T + params["b_hh"]
    r = jax.nn.sigmoid(gi[:, :F] + gh[:, :F])
    z = jax.nn.sigmoid(gi[:, F:2 * F] + gh[:, F:2 * F])
    n = jnp.tanh(gi[:, 2 * F:] + r * gh[:, 2 * F:])
    w_ev = (1.0 - z) * n + z * w0

    h = jnp.maximum(a_norm @ x @ w_ev, 0.0)
    return h @ params["w_lin"].T + params["b_lin"]


def init_params(key, F):
    ks = jax.random.split(key, 7)
    glorot = (6.0 / (F + F)) ** 0.5                     # glorot for initial_weight
    gru_lim = 1.0 / (F ** 0.5)                          # PyTorch GRU default init
    lin_lim = 1.0 / (F ** 0.5)                          # PyTorch Linear default init
    return {
        "w0":    jax.random.uniform(ks[0], (F, F), jnp.float32, -glorot, glorot),
        "w_ih":  jax.random.uniform(ks[1], (3 * F, F), jnp.float32, -gru_lim, gru_lim),
        "w_hh":  jax.random.uniform(ks[2], (3 * F, F), jnp.float32, -gru_lim, gru_lim),
        "b_ih":  jax.random.uniform(ks[3], (3 * F,), jnp.float32, -gru_lim, gru_lim),
        "b_hh":  jax.random.uniform(ks[4], (3 * F,), jnp.float32, -gru_lim, gru_lim),
        "w_lin": jax.random.uniform(ks[5], (F, F), jnp.float32, -lin_lim, lin_lim),
        "b_lin": jax.random.uniform(ks[6], (F,), jnp.float32, -lin_lim, lin_lim),
    }


if __name__ == "__main__":
    key = jax.random.PRNGKey(0)
    k_param, k_x, k_w = jax.random.split(key, 3)

    N, F = 32, 16                                       # num_nodes, node_features

    params = init_params(k_param, F)
    x = jax.random.normal(k_x, (N, F), jnp.float32)

    # deterministic ring-like graph, no self-loops
    nodes = jnp.arange(N, dtype=jnp.int32)
    src = jnp.concatenate([nodes, nodes])
    dst = jnp.concatenate([(nodes + 1) % N, (nodes + 3) % N]).astype(jnp.int32)
    edge_index = jnp.stack([src, dst], axis=0)          # (2, E)
    edge_weight = jax.random.uniform(k_w, (edge_index.shape[1],), jnp.float32, 0.5, 1.5)

    out = recurrent_gcn_egcno(x, edge_index, edge_weight, params)
    jax.block_until_ready(out)
    assert out.shape == (N, F)
    assert bool(jnp.all(jnp.isfinite(out)))

    # bf16 MXU path => loose tolerance vs f32 reference
    ref = _reference_forward(x, edge_index, edge_weight, params)
    err = float(jnp.max(jnp.abs(out - ref)))
    scale = float(jnp.max(jnp.abs(ref)))
    assert err <= 3e-2 + 1e-1 * scale, f"max abs err {err} vs ref scale {scale}"

    print("KERNEL_OK")
</pallas_src>

<mosaic_0001>
module attributes {stable_mosaic.version = 11 : i64} {
  func.func @_evolve_weight_kernel(%arg0: memref<16x16xf32, #tpu.memory_space<vmem>>, %arg1: memref<16x48xf32, #tpu.memory_space<vmem>>, %arg2: memref<16x48xf32, #tpu.memory_space<vmem>>, %arg3: memref<1x48xf32, #tpu.memory_space<vmem>>, %arg4: memref<1x48xf32, #tpu.memory_space<vmem>>, %arg5: memref<16x128xbf16, #tpu.memory_space<vmem>>) attributes {dimension_semantics = [], scalar_prefetch = 0 : i64, scratch_operands = 0 : i64, tpu.core_type = #tpu.core_type<tc>} {
    %c0 = arith.constant 0 : index
    %c0_0 = arith.constant 0 : index
    %0 = vector.load %arg0[%c0, %c0_0] : memref<16x16xf32, #tpu.memory_space<vmem>>, vector<16x16xf32>
    %c0_1 = arith.constant 0 : index
    %c0_2 = arith.constant 0 : index
    %1 = vector.load %arg1[%c0_1, %c0_2] : memref<16x48xf32, #tpu.memory_space<vmem>>, vector<16x48xf32>
    %cst = arith.constant dense<0.000000e+00> : vector<16x48xf32>
    %2 = tpu.matmul %0, %1, %cst {dimension_numbers = #tpu.dot_dimension_numbers<[1], [0], [0], [1], [0, 0, 1, 1], [], []>} : vector<16x16xf32>, vector<16x48xf32>, vector<16x48xf32> -> vector<16x48xf32>
    %c0_3 = arith.constant 0 : index
    %c0_4 = arith.constant 0 : index
    %3 = vector.load %arg3[%c0_3, %c0_4] : memref<1x48xf32, #tpu.memory_space<vmem>>, vector<1x48xf32>
    %4 = vector.broadcast %3 : vector<1x48xf32> to vector<16x48xf32>
    %5 = arith.addf %2, %4 : vector<16x48xf32>
    %c0_5 = arith.constant 0 : index
    %c0_6 = arith.constant 0 : index
    %6 = vector.load %arg2[%c0_5, %c0_6] : memref<16x48xf32, #tpu.memory_space<vmem>>, vector<16x48xf32>
    %cst_7 = arith.constant dense<0.000000e+00> : vector<16x48xf32>
    %7 = tpu.matmul %0, %6, %cst_7 {dimension_numbers = #tpu.dot_dimension_numbers<[1], [0], [0], [1], [0, 0, 1, 1], [], []>} : vector<16x16xf32>, vector<16x48xf32>, vector<16x48xf32> -> vector<16x48xf32>
    %c0_8 = arith.constant 0 : index
    %c0_9 = arith.constant 0 : index
    %8 = vector.load %arg4[%c0_8, %c0_9] : memref<1x48xf32, #tpu.memory_space<vmem>>, vector<1x48xf32>
    %9 = vector.broadcast %8 : vector<1x48xf32> to vector<16x48xf32>
    %10 = arith.addf %7, %9 : vector<16x48xf32>
    %11 = vector.extract_strided_slice %5 {offsets = [0, 0], sizes = [16, 16], strides = [1, 1]} : vector<16x48xf32> to vector<16x16xf32>
    %12 = vector.extract_strided_slice %10 {offsets = [0, 0], sizes = [16, 16], strides = [1, 1]} : vector<16x48xf32> to vector<16x16xf32>
    %13 = arith.addf %11, %12 : vector<16x16xf32>
    %14 = arith.negf %13 : vector<16x16xf32>
    %15 = math.exp %14 : vector<16x16xf32>
    %cst_10 = arith.constant 1.000000e+00 : f32
    %16 = vector.broadcast %cst_10 : f32 to vector<16x16xf32>
    %17 = arith.addf %16, %15 : vector<16x16xf32>
    %18 = arith.divf %16, %17 : vector<16x16xf32>
    %19 = vector.extract_strided_slice %5 {offsets = [0, 16], sizes = [16, 16], strides = [1, 1]} : vector<16x48xf32> to vector<16x16xf32>
    %20 = vector.extract_strided_slice %10 {offsets = [0, 16], sizes = [16, 16], strides = [1, 1]} : vector<16x48xf32> to vector<16x16xf32>
    %21 = arith.addf %19, %20 : vector<16x16xf32>
    %22 = arith.negf %21 : vector<16x16xf32>
    %23 = math.exp %22 : vector<16x16xf32>
    %cst_11 = arith.constant 1.000000e+00 : f32
    %24 = vector.broadcast %cst_11 : f32 to vector<16x16xf32>
    %25 = arith.addf %24, %23 : vector<16x16xf32>
    %26 = arith.divf %24, %25 : vector<16x16xf32>
    %27 = vector.extract_strided_slice %5 {offsets = [0, 32], sizes = [16, 16], strides = [1, 1]} : vector<16x48xf32> to vector<16x16xf32>
    %28 = vector.extract_strided_slice %10 {offsets = [0, 32], sizes = [16, 16], strides = [1, 1]} : vector<16x48xf32> to vector<16x16xf32>
    %29 = arith.mulf %18, %28 : vector<16x16xf32>
    %30 = arith.addf %27, %29 : vector<16x16xf32>
    %31 = math.tanh %30 : vector<16x16xf32>
    %cst_12 = arith.constant 1.000000e+00 : f32
    %32 = vector.broadcast %cst_12 : f32 to vector<16x16xf32>
    %33 = arith.subf %32, %26 : vector<16x16xf32>
    %34 = arith.mulf %33, %31 : vector<16x16xf32>
    %35 = arith.mulf %26, %0 : vector<16x16xf32>
    %36 = arith.addf %34, %35 : vector<16x16xf32>
    %cst_13 = arith.constant 0.000000e+00 : f32
    %37 = vector.broadcast %cst_13 : f32 to vector<16x112xf32>
    %38 = tpu.concatenate %36, %37 in 1 : vector<16x16xf32>, vector<16x112xf32> -> vector<16x128xf32>
    %39 = arith.truncf %38 : vector<16x128xf32> to vector<16x128xbf16>
    %c0_14 = arith.constant 0 : index
    %c0_15 = arith.constant 0 : index
    %40 = vector.load %arg5[%c0_14, %c0_15] : memref<16x128xbf16, #tpu.memory_space<vmem>>, vector<16x128xbf16>
    tpu.vector_store %arg5[%c0_14, %c0_15], %39 {strides = array<i32>} : memref<16x128xbf16, #tpu.memory_space<vmem>>, vector<16x128xbf16>,
    return
  }
}

</mosaic_0001>

<bundles_post_ra>
// kernel: tpu_custom_call.1
= control target key start
LH: loop header
LB: loop body
LE: loop exit
PB: predicated region body
PF: predicated region fallthrough
CT: control target
= control target key end

     0   :  { %10 = vsyncpa [#allocation3], 0  ;;  %s623_s0 = inlined_call_operand.hbm [shape: f32[16,16], index: 0, kind: input, shape index: {}]   ;;  %s624_s1 = inlined_call_operand.hbm [shape: f32[16,48], index: 1, kind: input, shape index: {}]   ;;  %s625_s2 = inlined_call_operand.hbm [shape: f32[16,48], index: 2, kind: input, shape index: {}]   ;;  %s626_s3 = inlined_call_operand.vmem [shape: f32[1,48], index: 3, kind: input, shape index: {}]   ;;  %s627_s4 = inlined_call_operand.vmem [shape: f32[1,48], index: 4, kind: input, shape index: {}]   ;;  %s628_s5 = inlined_call_operand.hbm [shape: bf16[16,128], index: 5, kind: output, shape index: {}]  }
   0x1   :  { %11 = vsyncpa [#allocation6], 0 }
   0x2   :  { %12 = vsyncpa [#allocation4], 0  ;;  %s505_s18 = smov [#allocation5]   ;;  %s506_s20 = smov [#allocation2]  }
   0x3   :  { %s30_s19 = sshll.u32 %s505_s18, 4  ;;  %s18_s21 = sshll.u32 %s506_s20, 4  ;;  %s31_s19 = int_to_ptr.vmem [resolvable:$true] %s30_s19  ;;  %s547_s21 = int_to_ptr.vmem [resolvable:$true] %s18_s21 }
   0x4   :  { %s411_s24 = scalar_lea.hbm %s624_s1, 256 }
   0x5   :  { %p412_p0 = scmp.ne.s32.totalorder %s624_s1, %s411_s24  ;;  %p415_p1 = scmp.lt.u32.totalorder %s411_s24, %s624_s1 }
   0x7   :  { %p417_p2 = pnand %p415_p1, %p412_p0 }
   0x9   :  { %420 = shalt.err (!%p417_p2)
}
   0xa   :  { %s421_s29 = scalar_lea.vmem %s31_s19, 256  ;;  %p426_p4 = scmp.lt.s32.totalorder %s31_s19, %s31_s19 }
   0xb   :  { %p422_p3 = scmp.ne.s32.totalorder %s31_s19, %s421_s29  ;;  %p427_p5 = scmp.lt.s32.totalorder %s421_s29, %s421_s29 }
   0xd   :  { %p428_p6 = por %p427_p5, %p426_p4 }
   0xf   :  { %p429_p7 = pnand %p428_p6, %p422_p3 }
  0x11   :  { %432 = shalt.err (!%p429_p7)
}
  0x12   :  { %s507_s30 = smov 128   ;;  %s508_s6 = smov 8  }
  0x13   :  { %36 = dma.hbm_to_vmem [thread:$0]  %s624_s1, 256, %s31_s19, [#allocation6], %s507_s30, %s507_s30, %s508_s6  }
  0x14   :  { %s433_s11 = scalar_lea.hbm %s623_s0, 256 }
  0x15   :  { %p434_p8 = scmp.ne.s32.totalorder %s623_s0, %s433_s11  ;;  %p437_p9 = scmp.lt.u32.totalorder %s433_s11, %s623_s0 }
  0x17   :  { %p439_p10 = pnand %p437_p9, %p434_p8 }
  0x19   :  { %442 = shalt.err (!%p439_p10)
}
  0x1a   :  { %s443_s16 = scalar_lea.vmem %s547_s21, 256  ;;  %p448_p12 = scmp.lt.s32.totalorder %s547_s21, %s547_s21 }
  0x1b   :  { %p444_p11 = scmp.ne.s32.totalorder %s547_s21, %s443_s16  ;;  %p449_p13 = scmp.lt.s32.totalorder %s443_s16, %s443_s16 }
  0x1d   :  { %p450_p0 = por %p449_p13, %p448_p12 }
  0x1f   :  { %p451_p1 = pnand %p450_p0, %p444_p11 }
  0x21   :  { %454 = shalt.err (!%p451_p1)
}
  0x22   :  { %24 = dma.hbm_to_vmem [thread:$0]  %s623_s0, 256, %s547_s21, [#allocation3], %s507_s30, %s507_s30, %s508_s6  }
  0x23   :  { %s509_s18 = smov [#allocation7]   ;;  %s455_s23 = scalar_lea.hbm %s625_s2, 256 }
  0x24   :  { %s42_s19 = sshll.u32 %s509_s18, 4  ;;  %p456_p2 = scmp.ne.s32.totalorder %s625_s2, %s455_s23  ;;  %s43_s19 = int_to_ptr.vmem [resolvable:$true] %s42_s19 }
  0x25   :  { %p459_p3 = scmp.lt.u32.totalorder %s455_s23, %s625_s2 }
  0x27   :  { %p461_p4 = pnand %p459_p3, %p456_p2 }
  0x29   :  { %464 = shalt.err (!%p461_p4)
}
  0x2a   :  { %s465_s28 = scalar_lea.vmem %s43_s19, 256  ;;  %p470_p6 = scmp.lt.s32.totalorder %s43_s19, %s43_s19 }
  0x2b   :  { %p466_p5 = scmp.ne.s32.totalorder %s43_s19, %s465_s28  ;;  %p471_p7 = scmp.lt.s32.totalorder %s465_s28, %s465_s28 }
  0x2d   :  { %p472_p8 = por %p471_p7, %p470_p6 }
  0x2f   :  { %p473_p9 = pnand %p472_p8, %p466_p5 }
  0x31   :  { %476 = shalt.err (!%p473_p9)
}
  0x32   :  { %48 = dma.hbm_to_vmem [thread:$0]  %s625_s2, 256, %s43_s19, [#allocation6], %s507_s30, %s507_s30, %s508_s6  }
  0x33   :  { %499 = dma.done.wait [#allocation3], 256  }
  0x34   :  { %500 = vsyncadd [#allocation3], 4294967040 }
  0x35   :  { %501 = dma.done.wait [#allocation6], 512  }
  0x36   :  { %502 = vsyncadd [#allocation6], 4294966784  ;;  %vm73_vm0 = vcmask 130048   ;;  %v64_v0 = vld [vmem:[#allocation5] sm:$0xff]  ;;  %v65_v1 = vld [vmem:[#allocation5 + $0x8] sm:$0xff]  ;;  %s510_s30 = smov 96  }
  0x37   :  { %v155_v2 = vld [vmem:[#allocation7] sm:$0xff]  ;;  %v374_v3 = vpack.c.bf16 %v65_v1, %v64_v0  ;;  %v156_v4 = vld [vmem:[#allocation7 + $0x8] sm:$0xff]  ;;  %s513_s8 = smov 16   ;;  %s514_s9 = smov [#allocation8]  }
  0x38   :  { %v62_v5 = vld [vmem:[#allocation2] sm:$0xff]  ;;  %v378_v6 = vpack.c.bf16 %v156_v4, %v155_v2  ;;  %v63_v7 = vld [vmem:[#allocation2 + $0x8] sm:$0xff]  ;;  %s322_s10 = sshll.u32 %s514_s9, 4  ;;  %s323_s10 = int_to_ptr.vmem [resolvable:$true] %s322_s10 }
  0x39   :  { %364 = vmatprep.mubr.msk.f32.mxu0 %vm73_vm0, %v62_v5  ;;  %371 = vmatprep.mubr.msk.f32.mxu1 %vm73_vm0, %v62_v5  ;;  %v338_v9 = vld [vmem:[%s627_s4] ss:$0 sm:$0xff]  ;;  %s511_s4 = smov 32   ;;  %s477_s11 = scalar_lea.vmem %s323_s10, 128 }
  0x3a   :  { %375 = vmatprep.subr.bf16.mxu0 %v374_v3  ;;  %379 = vmatprep.subr.bf16.mxu1 %v378_v6  ;;  %v335_v15 = vld [vmem:[%s626_s3] ss:$0 sm:$0xff]  ;;  %s512_s3 = smov 112   ;;  %p478_p10 = scmp.ne.s32.totalorder %s323_s10, %s477_s11 }
  0x3b   :  { %377 = vmatpush3.bf16.msra.mxu0 %v374_v3  ;;  %381 = vmatpush3.bf16.msra.mxu1 %v378_v6  ;;  %p482_p11 = scmp.lt.s32.totalorder %s323_s10, %s323_s10  ;;  %p483_p12 = scmp.lt.s32.totalorder %s477_s11, %s477_s11 }
  0x3d   :  { %p484_p13 = por %p483_p12, %p482_p11 }
  0x3e   :  { %365 = vmatmul.mubr.msk.f32.vlgmr.msra.gmra.mrb[0].mxu0 %vm73_vm0, %v63_v7  ;;  %372 = vmatmul.mubr.msk.f32.vlgmr.msra.gmra.mrb[0].mxu1 %vm73_vm0, %v63_v7 }
  0x3f   :  { %p485_p0 = pnand %p484_p13, %p478_p10 }
 0x111   :  { %v366_v8 = vpop.f32.mrb[0].mxu0  ;;  %v373_v10 = vpop.f32.mrb[0].mxu1 }
 0x112   :  { %v146_v11 = vpop.f32.mrb[1].mxu0  ;;  %v230_v12 = vpop.f32.mrb[1].mxu1  ;;  %v236_v14 = vadd.f32 %v373_v10, %v338_v9  ;;  %v152_v17 = vadd.f32 %v366_v8, %v335_v15 }
 0x113   :  { %v231_v13 = vadd.f32 %v338_v9, %v230_v12  ;;  %v147_v16 = vadd.f32 %v335_v15, %v146_v11 }
 0x114   :  { %v240_v19 = vadd.f32 %v236_v14, %v152_v17 }
 0x115   :  { %255 = vrot.lane.b32.xlu0 %v231_v13, %s510_s30  ;;  %v239_v18 = vadd.f32 %v231_v13, %v147_v16 }
 0x116   :  { %v342_v21 = vmul.f32 -1.442695, %v240_v19 }
 0x117   :  { %v341_v20 = vmul.f32 -1.442695, %v239_v18 }
 0x119   :  { %257 = vrot.lane.b32.xlu0 %v236_v14, %s510_s30  ;;  %399 = vpow2.f32 %v341_v20 }
 0x11a   :  { %401 = vpow2.f32 %v342_v21 }
 0x123   :  { %v400_v22 = vpop.eup %399 }
 0x124   :  { %v247_v23 = vadd.f32 1.0, %v400_v22  ;;  %v402_v24 = vpop.eup %401 }
 0x125   :  { %v248_v25 = vadd.f32 1.0, %v402_v24 }
 0x126   :  { %403 = vrcp.f32 %v247_v23 }
 0x127   :  { %405 = vrcp.f32 %v248_v25 }
 0x130   :  { %v404_v26 = vpop.eup %403 }
 0x131   :  { %v406_v29 = vpop.eup %405  ;;  %v275_v41 = vsub.f32 1.0, %v404_v26 }
 0x132   :  { %v276_v43 = vsub.f32 1.0, %v406_v29 }
 0x187   :  { %v256_v27 = vpop.permute.xlu0 %255 }
 0x188   :  { %v261_v28 = vmul.f32 %v404_v26, %v256_v27 }
 0x18a   :  { %265 = vrot.lane.b32.xlu1 %v261_v28, %s511_s4 }
 0x18b   :  { %v258_v30 = vpop.permute.xlu0 %257 }
 0x18c   :  { %v262_v31 = vmul.f32 %v406_v29, %v258_v30 }
 0x18e   :  { %267 = vrot.lane.b32.xlu1 %v262_v31, %s511_s4 }
 0x1fc   :  { %v266_v32 = vpop.permute.xlu1 %265 }
 0x1fd   :  { %v271_v33 = vadd.f32 %v266_v32, %v147_v16 }
 0x1ff   :  { %407 = vtanh.f32 %v271_v33 }
 0x200   :  { %v268_v34 = vpop.permute.xlu1 %267 }
 0x201   :  { %v272_v35 = vadd.f32 %v268_v34, %v152_v17 }
 0x203   :  { %409 = vtanh.f32 %v272_v35 }
 0x209   :  { %v408_v36 = vpop.eup %407 }
 0x20a   :  { %279 = vrot.lane.b32.xlu0 %v408_v36, %s512_s3 }
 0x20d   :  { %v410_v37 = vpop.eup %409 }
 0x20e   :  { %287 = vrot.lane.b32.xlu0 %v62_v5, %s513_s8  ;;  %281 = vrot.lane.b32.xlu1 %v410_v37, %s512_s3 }
 0x212   :  { %289 = vrot.lane.b32.xlu1 %v63_v7, %s513_s8 }
 0x27c   :  { %v280_v38 = vpop.permute.xlu0 %279 }
 0x27d   :  { %v285_v45 = vmul.f32 %v280_v38, %v275_v41 }
 0x280   :  { %v288_v39 = vpop.permute.xlu0 %287  ;;  %v282_v40 = vpop.permute.xlu1 %281 }
 0x281   :  { %v293_v42 = vmul.f32 %v404_v26, %v288_v39  ;;  %v286_v46 = vmul.f32 %v282_v40, %v276_v43 }
 0x283   :  { %v295_v48 = vadd.f32 %v293_v42, %v285_v45 }
 0x284   :  { %v290_v44 = vpop.permute.xlu1 %289 }
 0x285   :  { %v294_v47 = vmul.f32 %v406_v29, %v290_v44 }
 0x287   :  { %v296_v49 = vadd.f32 %v294_v47, %v286_v46 }
 0x289   :  { %v394_v50 = vpack.i.bf16 %v296_v49, %v295_v48 }
 0x28b   :  { %395 = vrot.lane.b32.xlu0 %v394_v50, %s512_s3 }
 0x2fd   :  { %v396_v51 = vpop.permute.xlu0 %395 }
 0x2fe   :  { %v398_v52 = vunpack.i.h.bf16 %v396_v51  ;;  %v397_v53 = vunpack.i.l.bf16 %v396_v51 }
 0x300   :  { %v306_v54 = vsel %vm73_vm0, %v398_v52, 0.0  ;;  %v305_v55 = vsel %vm73_vm0, %v397_v53, 0.0 }
 0x301   :  { %v350_v56 = vpack.c.bf16 %v306_v54, %v305_v55 }
 0x303   :  { %351 = vst [vmem:[#allocation8] sm:$0xff] %v350_v56  }
 0x304   :  { %488 = shalt.err (!%p485_p0)
}
 0x305   :  { %s489_s14 = scalar_lea.hbm %s628_s5, 128 }
 0x306   :  { %p490_p1 = scmp.ne.s32.totalorder %s628_s5, %s489_s14  ;;  %p493_p2 = scmp.lt.u32.totalorder %s489_s14, %s628_s5 }
 0x308   :  { %p495_p3 = pnand %p493_p2, %p490_p1 }
 0x30a   :  { %498 = shalt.err (!%p495_p3)
}
 0x30b   :  { %s515_s18 = smov 64   ;;  %s516_s19 = smov 4  }
 0x30c   :  { %328 = dma.vmem_to_hbm [thread:$0]  %s323_s10, 128, %s628_s5, [#allocation4], %s515_s18, %s515_s18, %s516_s19  }
 0x30d   :  { %503 = dma.done.wait [#allocation4], 128  }
 0x30e   :  { %504 = vsyncadd [#allocation4], 4294967168 }
 0x30f   :  { %332 = vsyncpa [#allocation3], 1 }
 0x310   :  { %333 = vsyncpa [#allocation6], 1 }
 0x311   :  { %334 = vsyncpa [#allocation4], 1 }

</bundles_post_ra>
